<compile_context>
chip_gen: v7x
topology: tpu7x:2x2x1
jax: 0.10.0
libtpu: 0.0.40
codegen_flags: <defaults>
</compile_context>

<pallas_src>
import jax
import jax.numpy as jnp
from jax.experimental import pallas as pl
from jax.experimental.pallas import tpu as pltpu


def _make_quantile_kernel(quantiles, tile_rows, chunk_rows, rows_valid, needs_mask):
    """Kernel with quantiles / tiling / valid-row count baked in as constants."""
    nq = len(quantiles)
    n_chunks = tile_rows // chunk_rows

    def kernel(preds_ref, target_ref, out_ref):
        # Quantile value per lane: flat element index = row*128 + lane, and
        # since 128 % Q == 0 the quantile index is simply lane % Q.
        # (Hoisted out of the chunk loop; VALU/XLU have large slack here.)
        lane = jax.lax.broadcasted_iota(jnp.int32, (1, 128), 1)
        lane_mod = lane % nq
        q_lane = jnp.zeros((1, 128), jnp.float32)
        for i, qv in enumerate(quantiles):            # unrolled at trace time
            q_lane = jnp.where(lane_mod == i, jnp.float32(qv), q_lane)
        qm1_lane = q_lane - 1.0

        tile_row0 = pl.program_id(0) * tile_rows

        def chunk_body(c, acc):
            r0 = pl.multiple_of(c * chunk_rows, chunk_rows)
            p = preds_ref[pl.ds(r0, chunk_rows), :].astype(jnp.float32)
            t = target_ref[pl.ds(r0, chunk_rows), :].astype(jnp.float32)
            e = t - p                                   # (chunk_rows, 128)
            pin = jnp.maximum(qm1_lane * e, q_lane * e)
            if needs_mask:
                # Partial last grid block: rows >= rows_valid are garbage from
                # the pipeline buffer -> discard with a select (not a multiply).
                row = jax.lax.broadcasted_iota(jnp.int32, (chunk_rows, 1), 0)
                valid = (tile_row0 + c * chunk_rows + row) < rows_valid
                pin = jnp.where(valid, pin, 0.0)
            # Cross-sublane partial reduce rides the XLU slot (free filler).
            return acc + jnp.sum(pin, axis=0, keepdims=True)

        acc0 = jnp.zeros((1, 128), jnp.float32)
        acc = jax.lax.fori_loop(0, n_chunks, chunk_body, acc0, unroll=True)
        out_ref[...] = acc[None]                        # (1, 1, 128), unmasked vst

    return kernel


def quantile_loss(preds, target, quantiles=(0.2, 0.5), *,
                  tile_rows=None, chunk_rows=None):
    assert preds.shape[0] == target.shape[0]
    B = preds.shape[0]
    nq = len(quantiles)
    assert preds.shape[1] >= nq and target.shape[1] >= nq

    if 128 % nq != 0:
        # TODO(synk): lane-dense layout needs Q to divide 128; pure-JAX fallback.
        return quantile_loss_ref(preds, target, quantiles)

    # TODO(synk): when preds/target are wider than Q this slice materializes a
    # copy; a manual-DMA (memory_space=pl.ANY) row-gather would avoid it.
    preds_q = preds if preds.shape[1] == nq else preds[:, :nq]
    target_q = target if target.shape[1] == nq else target[:, :nq]

    itemsize = max(jnp.dtype(preds_q.dtype).itemsize,
                   jnp.dtype(target_q.dtype).itemsize)

    total = B * nq
    rows_valid = -(-total // 128)                      # ceil(total / 128)

    # Free row-major reshape to a lane-dense (rows, 128) layout.  Pad only to
    # the 128-lane boundary (pinball(0) == 0; divide by the true B below).
    p_flat = preds_q.reshape(-1)
    t_flat = target_q.reshape(-1)
    pad = rows_valid * 128 - total
    if pad:
        p_flat = jnp.pad(p_flat, (0, pad))
        t_flat = jnp.pad(t_flat, (0, pad))
    p2 = p_flat.reshape(rows_valid, 128)
    t2 = t_flat.reshape(rows_valid, 128)

    # ---- tile-size selection -------------------------------------------------
    if tile_rows is None:
        tile_rows = 16384 if itemsize <= 2 else 8192   # ~4 MiB DMA tile / input
    tr = max(8, (int(tile_rows) // 8) * 8)
    # Keep 2 inputs x 2 pipeline buffers <= ~24 MiB (fits v7x's 64 MiB VMEM
    # with headroom for in-kernel temporaries).
    tr_vmem_cap = (24 << 20) // (2 * 2 * 128 * itemsize)
    tr = min(tr, max(8, (tr_vmem_cap // 8) * 8))
    # Don't exceed the data.
    tr = min(tr, ((rows_valid + 7) // 8) * 8)
    if tr > 512:                                       # keep chunking exact
        tr = (tr // 512) * 512
    # v7x has 2 TensorCores: make sure the parallel grid has >= 2 tiles.
    while -(-rows_valid // tr) < 2 and tr >= 16:
        tr = max(8, ((tr // 2) // 8) * 8)
        if tr > 512:
            tr = (tr // 512) * 512
    num_tiles = -(-rows_valid // tr)

    # In-kernel chunk size: bounds f32 temporaries / vreg pressure; <=16 chunks.
    if chunk_rows is None:
        cr = tr if tr <= 512 else max(512, tr // 16)
    else:
        cr = max(8, (int(chunk_rows) // 8) * 8)
        if tr % cr != 0:
            cr = tr if tr <= 512 else max(512, tr // 16)

    needs_mask = (num_tiles * tr) != rows_valid

    dma_bytes = 2 * 2 * tr * 128 * itemsize            # 2 inputs x 2 buffers
    vmem_limit = int(min(48 << 20, max(32 << 20, dma_bytes + (8 << 20))))

    partials = pl.pallas_call(
        _make_quantile_kernel(tuple(float(q) for q in quantiles),
                              tr, cr, rows_valid, needs_mask),
        out_shape=jax.ShapeDtypeStruct((num_tiles, 1, 128), jnp.float32),
        grid=(num_tiles,),
        in_specs=[
            pl.BlockSpec((tr, 128), lambda i: (i, 0)),   # preds tile
            pl.BlockSpec((tr, 128), lambda i: (i, 0)),   # target tile
        ],
        out_specs=pl.BlockSpec((1, 1, 128), lambda i: (i, 0, 0)),
        compiler_params=pltpu.CompilerParams(
            dimension_semantics=("parallel",),           # shard tiles across TCs
            vmem_limit_bytes=vmem_limit,
        ),
    )(p2, t2)

    # Tiny final reduce + mean over the TRUE batch size (not the padded count).
    return jnp.sum(partials) / jnp.float32(B)


def quantile_loss_ref(preds, target, quantiles=(0.2, 0.5)):
    # Pure-JAX reference mirroring the PyTorch code exactly.
    losses = []
    for i, q in enumerate(quantiles):
        e = target[:, i] - preds[:, i]
        losses.append(jnp.maximum((q - 1.0) * e, q * e)[:, None])
    return jnp.mean(jnp.sum(jnp.concatenate(losses, axis=1), axis=1))


if __name__ == "__main__":
    key = jax.random.PRNGKey(0)
    k1, k2 = jax.random.split(key)

    Q = 2
    quantiles = (0.2, 0.5)

    # Case 1: B*Q divisible by 128; default (production-style) tile selection.
    B = 2048
    preds = jax.random.normal(k1, (B, Q), dtype=jnp.float32)
    target = jax.random.normal(k2, (B, Q), dtype=jnp.float32)
    loss = jax.block_until_ready(quantile_loss(preds, target, quantiles))
    ref = quantile_loss_ref(preds, target, quantiles)
    assert jnp.allclose(loss, ref, atol=1e-5, rtol=1e-5), (loss, ref)

    # Case 2: small tile + small chunk -> multi-step grid AND multi-chunk
    # in-kernel loop (correctness only; not a perf configuration).
    loss_b = jax.block_until_ready(
        quantile_loss(preds, target, quantiles, tile_rows=16, chunk_rows=8))
    assert jnp.allclose(loss_b, ref, atol=1e-5, rtol=1e-5), (loss_b, ref)

    # Case 3: B*Q NOT divisible by 128 -> 128-boundary pad + in-kernel tail mask
    # over the partial grid block.
    B2 = 100
    preds2 = jax.random.normal(k1, (B2, Q), dtype=jnp.float32)
    target2 = jax.random.normal(k2, (B2, Q), dtype=jnp.float32)
    loss2 = jax.block_until_ready(quantile_loss(preds2, target2, quantiles))
    ref2 = quantile_loss_ref(preds2, target2, quantiles)
    assert jnp.allclose(loss2, ref2, atol=1e-5, rtol=1e-5), (loss2, ref2)

    # Case 4: bf16 inputs (halved HBM traffic; f32 accumulation in-kernel).
    preds_b16 = preds.astype(jnp.bfloat16)
    target_b16 = target.astype(jnp.bfloat16)
    loss3 = jax.block_until_ready(quantile_loss(preds_b16, target_b16, quantiles))
    ref3 = quantile_loss_ref(preds_b16.astype(jnp.float32),
                             target_b16.astype(jnp.float32), quantiles)
    assert jnp.allclose(loss3, ref3, atol=1e-3, rtol=1e-3), (loss3, ref3)

    print("KERNEL_OK")
</pallas_src>

<mosaic_0001>
module attributes {stable_mosaic.version = 11 : i64} {
  func.func @kernel(%arg0: i32, %arg1: memref<16x128xf32, #tpu.memory_space<vmem>>, %arg2: memref<16x128xf32, #tpu.memory_space<vmem>>, %arg3: memref<1x1x128xf32, #tpu.memory_space<vmem>>) attributes {dimension_semantics = [#tpu.dimension_semantics<parallel>], iteration_bounds = array<i64: 2>, scalar_prefetch = 0 : i64, scratch_operands = 0 : i64, tpu.core_type = #tpu.core_type<tc>, window_params = [{transform_indices = @transform_0, window_bounds = array<i64: 16, 128>}, {transform_indices = @transform_1, window_bounds = array<i64: 16, 128>}, {transform_indices = @transform_2, window_bounds = array<i64: 1, 1, 128>}]} {
    %0 = tpu.iota {dimensions = array<i32: 1>} : vector<1x128xi32>
    %c2_i32 = arith.constant 2 : i32
    %c0_i32 = arith.constant 0 : i32
    %1 = arith.cmpi eq, %c2_i32, %c0_i32 : i32
    %c1_i32 = arith.constant 1 : i32
    %2 = arith.select %1, %c1_i32, %c2_i32 : i32
    %3 = vector.broadcast %2 : i32 to vector<1x128xi32>
    %4 = arith.remsi %0, %3 : vector<1x128xi32>
    %c0_i32_0 = arith.constant 0 : i32
    %5 = vector.broadcast %c0_i32_0 : i32 to vector<1x128xi32>
    %6 = arith.cmpi ne, %4, %5 : vector<1x128xi32>
    %c0_i32_1 = arith.constant 0 : i32
    %7 = vector.broadcast %c0_i32_1 : i32 to vector<1x128xi32>
    %8 = arith.cmpi slt, %4, %7 : vector<1x128xi32>
    %c0_i32_2 = arith.constant 0 : i32
    %9 = arith.cmpi slt, %2, %c0_i32_2 : i32
    %10 = vector.broadcast %9 : i1 to vector<1x128xi1>
    %11 = vector.broadcast %10 : vector<1x128xi1> to vector<1x128xi1>
    %12 = arith.xori %8, %11 : vector<1x128xi1>
    %13 = arith.andi %12, %6 : vector<1x128xi1>
    %14 = vector.broadcast %2 : i32 to vector<1x128xi32>
    %15 = arith.addi %4, %14 : vector<1x128xi32>
    %16 = arith.select %13, %15, %4 : vector<1x128xi1>, vector<1x128xi32>
    %cst = arith.constant 0.000000e+00 : f32
    %17 = vector.broadcast %cst : f32 to vector<1x128xf32>
    %c0_i32_3 = arith.constant 0 : i32
    %18 = vector.broadcast %c0_i32_3 : i32 to vector<1x128xi32>
    %19 = arith.cmpi eq, %16, %18 : vector<1x128xi32>
    %cst_4 = arith.constant 2.000000e-01 : f32
    %20 = vector.broadcast %cst_4 : f32 to vector<1x128xf32>
    %21 = arith.select %19, %20, %17 : vector<1x128xi1>, vector<1x128xf32>
    %c1_i32_5 = arith.constant 1 : i32
    %22 = vector.broadcast %c1_i32_5 : i32 to vector<1x128xi32>
    %23 = arith.cmpi eq, %16, %22 : vector<1x128xi32>
    %cst_6 = arith.constant 5.000000e-01 : f32
    %24 = vector.broadcast %cst_6 : f32 to vector<1x128xf32>
    %25 = arith.select %23, %24, %21 : vector<1x128xi1>, vector<1x128xf32>
    %cst_7 = arith.constant 1.000000e+00 : f32
    %26 = vector.broadcast %cst_7 : f32 to vector<1x128xf32>
    %27 = arith.subf %25, %26 : vector<1x128xf32>
    %cst_8 = arith.constant 0.000000e+00 : f32
    %28 = vector.broadcast %cst_8 : f32 to vector<1x128xf32>
    %c0_i32_9 = arith.constant 0 : i32
    %c16_i32 = arith.constant 16 : i32
    %29 = arith.muli %c0_i32_9, %c16_i32 : i32
    %30 = tpu.assume_multiple %29, 16 : i32
    %31 = arith.index_cast %30 : i32 to index
    %c0 = arith.constant 0 : index
    %32 = vector.load %arg1[%31, %c0] : memref<16x128xf32, #tpu.memory_space<vmem>>, vector<16x128xf32>
    %33 = arith.index_cast %30 : i32 to index
    %c0_10 = arith.constant 0 : index
    %34 = vector.load %arg2[%33, %c0_10] : memref<16x128xf32, #tpu.memory_space<vmem>>, vector<16x128xf32>
    %35 = arith.subf %34, %32 : vector<16x128xf32>
    %36 = vector.broadcast %27 : vector<1x128xf32> to vector<16x128xf32>
    %37 = arith.mulf %36, %35 : vector<16x128xf32>
    %38 = vector.broadcast %25 : vector<1x128xf32> to vector<16x128xf32>
    %39 = arith.mulf %38, %35 : vector<16x128xf32>
    %40 = arith.maximumf %37, %39 : vector<16x128xf32>
    %cst_11 = arith.constant dense<0.000000e+00> : vector<128xf32>
    %41 = vector.multi_reduction <add>, %40, %cst_11 [0] : vector<16x128xf32> to vector<128xf32>
    %42 = vector.shape_cast %41 : vector<128xf32> to vector<1x128xf32>
    %43 = arith.addf %28, %42 : vector<1x128xf32>
    %c1_i32_12 = arith.constant 1 : i32
    %44 = vector.shape_cast %43 : vector<1x128xf32> to vector<1x1x128xf32>
    %c0_13 = arith.constant 0 : index
    %c0_14 = arith.constant 0 : index
    %c0_15 = arith.constant 0 : index
    %45 = vector.load %arg3[%c0_13, %c0_14, %c0_15] : memref<1x1x128xf32, #tpu.memory_space<vmem>>, vector<1x1x128xf32>
    tpu.vector_store %arg3[%c0_13, %c0_14, %c0_15], %44 {strides = array<i32>} : memref<1x1x128xf32, #tpu.memory_space<vmem>>, vector<1x1x128xf32>,
    return
  }
  func.func @transform_0(%arg0: i32) -> (i32, i32) {
    %c0_i32 = arith.constant 0 : i32
    %c0_i32_0 = arith.constant 0 : i32
    return %arg0, %c0_i32 : i32, i32
  }
  func.func @transform_1(%arg0: i32) -> (i32, i32) {
    %c0_i32 = arith.constant 0 : i32
    %c0_i32_0 = arith.constant 0 : i32
    return %arg0, %c0_i32 : i32, i32
  }
  func.func @transform_2(%arg0: i32) -> (i32, i32, i32) {
    %c0_i32 = arith.constant 0 : i32
    %c0_i32_0 = arith.constant 0 : i32
    %c0_i32_1 = arith.constant 0 : i32
    return %arg0, %c0_i32, %c0_i32_0 : i32, i32, i32
  }
}

</mosaic_0001>

<bundles_post_ra>
// kernel: tpu_custom_call.1
= control target key start
LH: loop header
LB: loop body
LE: loop exit
PB: predicated region body
PF: predicated region fallthrough
CT: control target
= control target key end

     0   :  { %7 = vsyncpa [#allocation3], 0  ;;  %s792_s0 = inlined_call_operand.hbm [shape: f32[32,128], index: 0, kind: input, shape index: {}]   ;;  %s793_s1 = inlined_call_operand.hbm [shape: f32[32,128], index: 1, kind: input, shape index: {}]   ;;  %s794_s2 = inlined_call_operand.hbm [shape: f32[2,1,128], index: 2, kind: output, shape index: {}]  }
   0x1   :  { %9 = vsyncpa [#allocation3 + $0x1], 0 }
   0x2   :  { %10 = vsyncpa [#allocation6], 0 }
   0x3   :  { %12 = vsyncpa [#allocation6 + $0x1], 0 }
   0x4   :  { %13 = vsyncpa [#allocation4], 0 }
   0x5   :  { %15 = vsyncpa [#allocation4 + $0x1], 0  ;;  %s570_s9 = smov 0   ;;  %s572_s10 = smov 0  }
   0x6   :  { %s574_s11 = smov 0   ;;  %s576_s12 = smov 0  }
   0x7 LB: > { %s591_s13 = sadd.s32 4294967295, %s547_s12   ;;  %s345_s14 = sadd.s32 4294967294, %s547_s12   ;;  %s547_s12 = sphi %s576_s12, %s810_s12   ;;  %s543_s11 = sphi %s574_s11, %s809_s11   ;;  %s539_s10 = sphi %s572_s10, %s808_s10   ;;  %s535_s9 = sphi %s570_s9, %s807_s9  }
   0x8   : > { %s595_s15 = sadd.s32 1, %s547_s12   ;;  %s28_s16 = sadd.s32 1, %s543_s11 }
   0x9   : > { %s25_s17 = ssub.s32 %s547_s12, %s595_s15  ;;  %p35_p0 = scmp.ne.s32.totalorder %s543_s11, %s539_s10 }
   0xa   : > { %p26_p1 = scmp.eq.s32.totalorder %s25_s17, 0  ;;  %p36_p2 = scmp.eq.s32.totalorder %s547_s12, 0 }
   0xb   : > { %p41_p3 = scmp.ne.s32.totalorder %s539_s10, %s535_s9  ;;  %p42_p4 = scmp.eq.s32.totalorder %s591_s13, 0 }
   0xc   : > { %s607_s18 = scalar_select %p26_p1, %s543_s11, %s28_s16  }
   0xd   : > { %p609_p5 = por %p36_p2, %p35_p0  ;;  %p613_p6 = por %p42_p4, %p41_p3 }
   0xe   : > { %p91_p7 = scmp.eq.s32.totalorder %s591_s13, 1  ;;  %p97_p8 = scmp.eq.s32.totalorder %s345_s14, 1 }
   0xf   : > { %s798_s20 = scalar_select %p613_p6, 1, 0 }
  0x10   : > { %p380_p10 = scmp.lt.s32.totalorder %s547_s12, 2  ;;  %p620_p11 = por %p91_p7, %p35_p0 }
  0x11   : > { %p624_p12 = por %p97_p8, %p41_p3  ;;  %s629_s23 = sand.u32 1, %s543_s11  }
  0x12   : > { %s799_s21 = scalar_select %p620_p11, 1, 0 }
  0x13   : > { %s800_s22 = scalar_select %p624_p12, 1, 0 }
  0x14   : > { %s361_s24 = sshll.u32 %s547_s12, 8  ;;  %s348_s25 = sshll.u32 %s629_s23, 4 }
  0x15   : > { %s638_s28 = scalar_lea.hbm %s792_s0, %s361_s24  ;;  %s121_s29 = scalar_lea.vmem [#allocation2], %s348_s25 }
  0x16   : > { %s128_s30 = sshll.u32 %s121_s29, 4  ;;  %p644_p13 = pnand %p380_p10, %p609_p5  ;;  %s648_s30 = int_to_ptr.vmem [resolvable:$true] %s128_s30 }
  0x17   : > { %s118_s4 = scalar_lea.sflag [#allocation3], %s629_s23  ;;  %s417_s5 = scalar_lea.hbm %s638_s28, 256 }
  0x18   : > { %p418_p0 = scmp.ne.s32.totalorder %s638_s28, %s417_s5  ;;  %p419_p1 = pneg %p644_p13 }
  0x19   : > { %s422_s8 = scalar_lea.hbm %s792_s0, 512  ;;  %p423_p4 = scmp.lt.u32.totalorder %s638_s28, %s792_s0 }
  0x1a   : > { %p420_p2 = pnand %p419_p1, %p418_p0  ;;  %p424_p5 = scmp.lt.u32.totalorder %s422_s8, %s417_s5 }
  0x1b   : > { %p426_p8 = scmp.lt.u32.totalorder %s417_s5, %s638_s28 }
  0x1c   : > { %p421_p3 = pneg %p420_p2  ;;  %p425_p7 = por %p424_p5, %p423_p4 }
  0x1e   : > { %p427_p10 = por %p426_p8, %p425_p7 }
  0x20   : > { %p428_p9 = pnand %p427_p10, %p421_p3 }
  0x22   : > { %431 = shalt.err (!%p428_p9)
}
  0x23   : > { %s432_s17 = scalar_lea.vmem %s648_s30, 256  ;;  %s549_s19 = smov [#allocation2]  }
  0x24   : > { %p433_p0 = scmp.ne.s32.totalorder %s648_s30, %s432_s17  ;;  %s437_s26 = sshll.u32 %s549_s19, 4  ;;  %s438_s26 = int_to_ptr.vmem [resolvable:$false] %s437_s26 }
  0x25   : > { %s439_s27 = scalar_lea.vmem %s438_s26, 512  ;;  %p440_p11 = scmp.lt.s32.totalorder %s648_s30, %s438_s26 }
  0x26   : > { %p435_p2 = pnand %p433_p0, %p419_p1  ;;  %p441_p4 = scmp.lt.s32.totalorder %s439_s27, %s432_s17 }
  0x28   : > { %p436_p12 = pneg %p435_p2  ;;  %p442_p5 = por %p441_p4, %p440_p11 }
  0x2a   : > { %p443_p7 = pnand %p442_p5, %p436_p12 }
  0x2c   : > { %446 = shalt.err (!%p443_p7)
}
  0x2d   : > { %s550_s29 = smov 128   ;;  %s551_s5 = smov 8  }
  0x2e   : > { %372 = dma.hbm_to_vmem [thread:$0]  (!%p644_p13), %s638_s28, 256, %s648_s30, %s118_s4, %s550_s29, %s550_s29, %s551_s5  }
  0x2f   : > { %p354_p9 = scmp.ge.s32.totalorder %s547_s12, 1  ;;  %p157_p11 = scmp.lt.s32.totalorder %s547_s12, 3 }
  0x30   : > { %s692_s14 = scalar_lea.hbm %s793_s1, %s361_s24  ;;  %s142_s16 = scalar_lea.vmem [#allocation5], %s348_s25 }
  0x31   : > { %p683_p12 = pnand %p354_p9, %p157_p11  ;;  %s149_s17 = sshll.u32 %s142_s16, 4  ;;  %s696_s17 = int_to_ptr.vmem [resolvable:$true] %s149_s17 }
  0x32   : > { %s139_s28 = scalar_lea.sflag [#allocation6], %s629_s23  ;;  %s447_s30 = scalar_lea.hbm %s692_s14, 256 }
  0x33   : > { %p448_p3 = scmp.ne.s32.totalorder %s692_s14, %s447_s30  ;;  %s452_s24 = scalar_lea.hbm %s793_s1, 512 }
  0x34   : > { %p453_p0 = scmp.lt.u32.totalorder %s692_s14, %s793_s1  ;;  %p454_p2 = scmp.lt.u32.totalorder %s452_s24, %s447_s30 }
  0x35   : > { %p450_p8 = pnand %p448_p3, %p419_p1  ;;  %p456_p5 = scmp.lt.u32.totalorder %s447_s30, %s692_s14 }
  0x36   : > { %p455_p4 = por %p454_p2, %p453_p0 }
  0x37   : > { %p451_p10 = pneg %p450_p8 }
  0x38   : > { %p457_p7 = por %p456_p5, %p455_p4 }
  0x3a   : > { %p458_p9 = pnand %p457_p7, %p451_p10 }
  0x3c   : > { %461 = shalt.err (!%p458_p9)
}
  0x3d   : > { %s462_s25 = scalar_lea.vmem %s696_s17, 256  ;;  %s552_s7 = smov [#allocation5]  }
  0x3e   : > { %p463_p11 = scmp.ne.s32.totalorder %s696_s17, %s462_s25  ;;  %s467_s8 = sshll.u32 %s552_s7, 4  ;;  %s468_s8 = int_to_ptr.vmem [resolvable:$false] %s467_s8 }
  0x3f   : > { %s469_s16 = scalar_lea.vmem %s468_s8, 512  ;;  %p470_p6 = scmp.lt.s32.totalorder %s696_s17, %s468_s8 }
  0x40   : > { %p465_p3 = pnand %p463_p11, %p419_p1  ;;  %p471_p0 = scmp.lt.s32.totalorder %s469_s16, %s462_s25 }
  0x42   : > { %p466_p8 = pneg %p465_p3  ;;  %p472_p2 = por %p471_p0, %p470_p6 }
  0x44   : > { %p473_p4 = pnand %p472_p2, %p466_p8 }
  0x46   : > { %476 = shalt.err (!%p473_p4)
}
  0x47   : > { %375 = dma.hbm_to_vmem [thread:$0]  (!%p644_p13), %s692_s14, 256, %s696_s17, %s139_s28, %s550_s29, %s550_s29, %s551_s5  }
  0x48   : > { %161 = sbr.rel (%p683_p12) target bundleno = 125 (0x7d), region = 28  ;;  %s730_s30 = sand.u32 (!%p683_p12), 1, %s539_s10  }
  0x49   : > { %s355_s4 = sshll.u32 (!%p683_p12), %s730_s30, 4  ;;  %s164_s19 = scalar_lea.sflag (!%p683_p12), [#allocation3], %s730_s30 }
  0x4a   : > { %s167_s3 = scalar_lea.vmem (!%p683_p12), [#allocation2], %s355_s4  ;;  %p803_p6 = scmp.ne.s32.totalorder (!%p683_p12), %s798_s20, 0 }
  0x4f   : > { %522 = dma.done.wait (%p803_p6), %s164_s19, 256  }
  0x50   : > { %524 = vsyncadd (%p803_p6), %s164_s19, 4294967040  ;;  %s173_s23 = scalar_lea.sflag [#allocation6], %s730_s30  ;;  %s176_s29 = scalar_lea.vmem [#allocation5], %s355_s4 }
  0x51   : > { %526 = dma.done.wait (%p803_p6), %s173_s23, 256  }
  0x52   : > { %528 = vsyncadd (%p803_p6), %s173_s23, 4294967040  ;;  %v203_v0 = vlaneseq  ;;  %v553_v3 = vmov 0.0   ;;  %v222_v5 = vld [vmem:[%s167_s3] sm:$0xff]  ;;  %v223_v6 = vld [vmem:[%s167_s3 + $0x8] sm:$0xff]  ;;  %s200_s20 = scalar_lea.vmem [#allocation7], %s730_s30  ;;  %s358_s6 = sshll.u32 %s591_s13, 4 }
  0x53   : > { %v224_v7 = vld [vmem:[%s176_s29] sm:$0xff]  ;;  %v225_v9 = vld [vmem:[%s176_s29 + $0x8] sm:$0xff]  ;;  %s256_s5 = sshll.u32 %s200_s20, 4  ;;  %s750_s28 = scalar_lea.hbm %s794_s2, %s358_s6  ;;  %s745_s5 = int_to_ptr.vmem [resolvable:$true] %s256_s5 }
  0x54   : > { %v204_v1 = vand.u32 127, %v203_v0  ;;  %v226_v10 = vsub.f32 %v224_v7, %v222_v5  ;;  %v227_v12 = vsub.f32 %v225_v9, %v223_v6  ;;  %s244_s24 = scalar_lea.sflag [#allocation4], %s730_s30  ;;  %s477_s26 = scalar_lea.vmem %s745_s5, 16 }
  0x55   : > { %p478_p13 = scmp.ne.s32.totalorder %s745_s5, %s477_s26  ;;  %p804_p1 = scmp.ne.s32.totalorder %s799_s21, 0 }
  0x56   : > { %v209_v2 = vand.u32 1, %v204_v1  ;;  %s554_s13 = smov [#allocation7]  }
  0x57   : > { %p479_p12 = pnand %p478_p13, %p804_p1  ;;  %s481_s27 = sshll.u32 %s554_s13, 4  ;;  %s482_s27 = int_to_ptr.vmem [resolvable:$false] %s481_s27 }
  0x58   : > { %vm217_vm0 = vcmp.eq.s32.totalorder %v209_v2, 0  ;;  %vm219_vm1 = vcmp.eq.s32.totalorder %v209_v2, 1  ;;  %s483_s25 = scalar_lea.vmem %s482_s27, 32  ;;  %p484_p5 = scmp.lt.s32.totalorder %s745_s5, %s482_s27 }
  0x59   : > { %v218_v4 = vsel %vm217_vm0, 0.2, %v553_v3  ;;  %p480_p10 = pneg %p479_p12  ;;  %p485_p7 = scmp.lt.s32.totalorder %s483_s25, %s477_s26 }
  0x5a   : > { %v220_v8 = vsel %vm219_vm1, 0.5, %v218_v4 }
  0x5b   : > { %v357_v11 = vadd.f32 -1.0, %v220_v8  ;;  %v230_v13 = vmul.f32 %v226_v10, %v220_v8  ;;  %v231_v16 = vmul.f32 %v227_v12, %v220_v8  ;;  %p486_p9 = por %p485_p7, %p484_p5 }
  0x5d   : > { %v228_v14 = vmul.f32 %v357_v11, %v226_v10  ;;  %v229_v15 = vmul.f32 %v357_v11, %v227_v12  ;;  %p487_p11 = pnand %p486_p9, %p480_p10 }
  0x5f   : > { %v232_v17 = vmax.f32 %v228_v14, %v230_v13  ;;  %v233_v18 = vmax.f32 %v229_v15, %v231_v16 }
  0x61   : > { %v234_v19 = vadd.f32 %v233_v18, %v232_v17 }
  0x63   : > { %v235_v20 = vrot.slane %v234_v19, 4 }
  0x65   : > { %v236_v21 = vadd.f32 %v235_v20, %v234_v19 }
  0x67   : > { %v237_v22 = vrot.slane %v236_v21, 2 }
  0x69   : > { %v238_v23 = vadd.f32 %v237_v22, %v236_v21 }
  0x6b   : > { %v239_v24 = vrot.slane %v238_v23, 1 }
  0x6d   : > { %v240_v25 = vadd.f32 %v239_v24, %v238_v23 }
  0x6f   : > { %242 = vst [vmem:[%s200_s20] sm:$0x1] %v240_v25 }
  0x70   : > { %490 = shalt.err (!%p487_p11)
}
  0x71   : > { %s491_s7 = scalar_lea.hbm %s750_s28, 16  ;;  %s495_s30 = scalar_lea.hbm %s794_s2, 32 }
  0x72   : > { %p492_p3 = scmp.ne.s32.totalorder %s750_s28, %s491_s7  ;;  %p496_p2 = scmp.lt.u32.totalorder %s750_s28, %s794_s2 }
  0x73   : > { %p497_p4 = scmp.lt.u32.totalorder %s495_s30, %s491_s7  ;;  %p499_p13 = scmp.lt.u32.totalorder %s491_s7, %s750_s28 }
  0x74   : > { %p493_p8 = pnand %p492_p3, %p804_p1 }
  0x75   : > { %p498_p6 = por %p497_p4, %p496_p2 }
  0x76   : > { %p494_p0 = pneg %p493_p8 }
  0x77   : > { %p500_p12 = por %p499_p13, %p498_p6 }
  0x79   : > { %p501_p10 = pnand %p500_p12, %p494_p0 }
  0x7b   : > { %504 = shalt.err (!%p501_p10)
}
  0x7c   : > { %367 = dma.vmem_to_hbm [thread:$0]  (%p804_p1), %s745_s5, 16, %s750_s28, %s244_s24  }
  0x7d PF: > { %s268_s3 = sand.u32 1, %s535_s9   ;;  %p805_p5 = scmp.ne.s32.totalorder %s800_s22, 0 }
  0x7e   : > { %p806_p7 = scmp.ge.s32.totalorder %s547_s12, 2  ;;  %s269_s23 = scalar_lea.sflag [#allocation4], %s268_s3 }
  0x80   : > { %p377_p9 = pnand %p806_p7, %p805_p5 }
  0x82   : > { %530 = dma.done.wait (!%p377_p9), %s269_s23, 16  }
  0x83   : > { %532 = vsyncadd (!%p377_p9), %s269_s23, 4294967280  ;;  %p18_p11 = scmp.ge.s32.totalorder %s595_s15, 4   ;;  %s807_s9 = smov %s539_s10 }
  0x84   : > { %s808_s10 = smov %s543_s11  ;;  %s809_s11 = smov %s607_s18 }
  0x85   : > { %s810_s12 = smov %s595_s15  ;;  %20 = sbr.rel (!%p18_p11) target bundleno = 7 (0x7), region = 86 }
  0x8c   :  { %273 = vsyncpa [#allocation3], 1 }
  0x8d   :  { %275 = vsyncpa [#allocation3 + $0x1], 1 }
  0x8e   :  { %276 = vsyncpa [#allocation6], 1 }
  0x8f   :  { %278 = vsyncpa [#allocation6 + $0x1], 1 }
  0x90   :  { %279 = vsyncpa [#allocation4], 1 }
  0x91   :  { %281 = vsyncpa [#allocation4 + $0x1], 1 }

</bundles_post_ra>
